<compile_context>
chip_gen: v5e
topology: v5e:2x2
jax: 0.10.0
libtpu: 0.0.40
codegen_flags: <defaults>
</compile_context>

<pallas_src>
from typing import NamedTuple

import jax
import jax.numpy as jnp
from jax.experimental import pallas as pl
from jax.experimental.pallas import tpu as pltpu


def _round_up(x: int, m: int) -> int:
    return ((x + m - 1) // m) * m


def _pad2(a, rows, cols):
    pr, pc = rows - a.shape[0], cols - a.shape[1]
    if pr or pc:
        a = jnp.pad(a, ((0, pr), (0, pc)))
    return a


def _split_dim(dim: int, max_tile: int, prefer_two_tiles: bool):
    """Pick a 128-aligned tile and padded extent; optionally force >=2 tiles."""
    d128 = _round_up(dim, 128)
    n_tiles = -(-d128 // max_tile)
    if prefer_two_tiles and n_tiles < 2 and d128 >= 256:
        n_tiles = 2                      # v7x megacore: give both TCs work
    tile = _round_up(-(-d128 // n_tiles), 128)
    return tile, n_tiles * tile


# ---------------------------------------------------------------------------
# Kernels
# ---------------------------------------------------------------------------
def _bayes_linear_sample_kernel(x_ref, wmu_ref, wstd_ref, weps_ref,
                                bmu_ref, bstd_ref, beps_ref,
                                o_ref):
    k = pl.program_id(1)                 # reduction (in_features) tile index

    @pl.when(k == 0)
    def _init():
        o_ref[...] = jnp.zeros_like(o_ref)

    # Reparameterized weight tile: W = mu + std * eps  (std precomputed once in
    # prepare_params -> no in-kernel exp; eps streamed as bf16).
    w = wmu_ref[...] + wstd_ref[...] * weps_ref[...].astype(jnp.float32)

    # Weights are stored as (in, out): lane-dense output, no in-kernel w.T.
    # Accumulate directly into the (f32, resident-across-k) output block.
    o_ref[...] += jnp.dot(x_ref[...], w, preferred_element_type=jnp.float32)

    @pl.when(k == pl.num_programs(1) - 1)
    def _finalize():
        b = bmu_ref[...] + bstd_ref[...] * beps_ref[...]
        o_ref[...] += b


def _bayes_linear_mu_kernel(x_ref, wmu_ref, bmu_ref, o_ref):
    # Deterministic path (sample=False): y = x @ mu_w + mu_b.  No eps / std
    # streams at all.
    k = pl.program_id(1)

    @pl.when(k == 0)
    def _init():
        o_ref[...] = jnp.zeros_like(o_ref)

    o_ref[...] += jnp.dot(x_ref[...], wmu_ref[...],
                          preferred_element_type=jnp.float32)

    @pl.when(k == pl.num_programs(1) - 1)
    def _finalize():
        o_ref[...] += bmu_ref[...]


# ---------------------------------------------------------------------------
# Parameter preparation (one-time; hoisted out of the per-call forward)
# ---------------------------------------------------------------------------
class BayesianLinearParams(NamedTuple):
    weight_mu_t: jax.Array    # (I_pad, O_pad) f32, transposed + padded
    weight_std_t: jax.Array   # (I_pad, O_pad) f32, exp(0.5*logvar).T, zero-padded
    bias_mu: jax.Array        # (1, O_pad) f32
    bias_std: jax.Array       # (1, O_pad) f32
    in_features: int
    out_features: int
    tn: int
    tk: int


def prepare_params(weight_mu, weight_log_var, bias_mu, bias_log_var,
                   *, max_tn=1024, max_tk=1024) -> BayesianLinearParams:
    """Transpose/pad parameters and fold exp(0.5*logvar) -> std, ONCE."""
    O, I = weight_mu.shape
    tn, O_pad = _split_dim(O, max_tn, prefer_two_tiles=True)
    tk, I_pad = _split_dim(I, max_tk, prefer_two_tiles=False)
    f32 = jnp.float32
    wmu_t = _pad2(weight_mu.astype(f32).T, I_pad, O_pad)
    wstd_t = _pad2(jnp.exp(0.5 * weight_log_var.astype(f32)).T, I_pad, O_pad)
    bmu2 = _pad2(bias_mu.astype(f32).reshape(1, O), 1, O_pad)
    bstd2 = _pad2(jnp.exp(0.5 * bias_log_var.astype(f32)).reshape(1, O), 1, O_pad)
    return BayesianLinearParams(wmu_t, wstd_t, bmu2, bstd2, I, O, tn, tk)


def _draw_eps(noise_key, I_pad, O_pad):
    kw, kb = jax.random.split(noise_key)
    # bf16 halves the only extra HBM stream on the sample path; the bias eps is
    # a single row so f32 is fine.  Padded std is zero, so padded eps is inert.
    w_eps = jax.random.normal(kw, (I_pad, O_pad), dtype=jnp.bfloat16)
    b_eps = jax.random.normal(kb, (1, O_pad), dtype=jnp.float32)
    return w_eps, b_eps


# ---------------------------------------------------------------------------
# Forward
# ---------------------------------------------------------------------------
def bayesian_linear_forward(x, params: BayesianLinearParams,
                            noise_key=None, sample=True):
    """Pallas TPU implementation of BayesianLinear.forward."""
    B, I = x.shape
    assert I == params.in_features
    O = params.out_features
    tn, tk = params.tn, params.tk
    I_pad, O_pad = params.weight_mu_t.shape
    B_pad = _round_up(B, 8)

    # TODO(synk): for training-sized batches, tile B as an extra parallel grid
    # axis (and keep x resident) instead of re-streaming x per N tile; VCL
    # batches are small so it is kept untiled here.
    x_p = _pad2(x.astype(jnp.float32), B_pad, I_pad)

    grid = (O_pad // tn, I_pad // tk)          # (N tiles, K tiles); reduction last
    compiler_params = pltpu.CompilerParams(
        dimension_semantics=("parallel", "arbitrary"),
        vmem_limit_bytes=48 * 1024 * 1024,     # <= v7x's 64 MiB physical per TC
    )
    out_shape = jax.ShapeDtypeStruct((B_pad, O_pad), jnp.float32)

    if sample:
        if noise_key is None:
            noise_key = jax.random.PRNGKey(0)
        w_eps, b_eps = _draw_eps(noise_key, I_pad, O_pad)

        grid_spec = pltpu.PrefetchScalarGridSpec(
            num_scalar_prefetch=0,
            grid=grid,
            in_specs=[
                pl.BlockSpec((B_pad, tk), lambda n, k: (0, k)),   # x
                pl.BlockSpec((tk, tn), lambda n, k: (k, n)),      # weight_mu^T
                pl.BlockSpec((tk, tn), lambda n, k: (k, n)),      # weight_std^T
                pl.BlockSpec((tk, tn), lambda n, k: (k, n)),      # weight eps (bf16)
                pl.BlockSpec((1, tn), lambda n, k: (0, n)),       # bias_mu
                pl.BlockSpec((1, tn), lambda n, k: (0, n)),       # bias_std
                pl.BlockSpec((1, tn), lambda n, k: (0, n)),       # bias eps
            ],
            out_specs=pl.BlockSpec((B_pad, tn), lambda n, k: (0, n)),
        )
        out = pl.pallas_call(
            _bayes_linear_sample_kernel,
            out_shape=out_shape,
            grid_spec=grid_spec,
            compiler_params=compiler_params,
        )(x_p, params.weight_mu_t, params.weight_std_t, w_eps,
          params.bias_mu, params.bias_std, b_eps)
    else:
        grid_spec = pltpu.PrefetchScalarGridSpec(
            num_scalar_prefetch=0,
            grid=grid,
            in_specs=[
                pl.BlockSpec((B_pad, tk), lambda n, k: (0, k)),   # x
                pl.BlockSpec((tk, tn), lambda n, k: (k, n)),      # weight_mu^T
                pl.BlockSpec((1, tn), lambda n, k: (0, n)),       # bias_mu
            ],
            out_specs=pl.BlockSpec((B_pad, tn), lambda n, k: (0, n)),
        )
        out = pl.pallas_call(
            _bayes_linear_mu_kernel,
            out_shape=out_shape,
            grid_spec=grid_spec,
            compiler_params=compiler_params,
        )(x_p, params.weight_mu_t, params.bias_mu)

    return out[:B, :O]


def init_params(key, in_features, out_features):
    """Deterministic parameter init matching BayesianLinear.reset_parameters()."""
    k1, k2 = jax.random.split(key)
    std = jnp.sqrt(2.0 / in_features)   # kaiming_normal_, fan_in, relu
    weight_mu = std * jax.random.normal(k1, (out_features, in_features), dtype=jnp.float32)
    weight_log_var = jnp.full((out_features, in_features), -6.0, dtype=jnp.float32)
    bias_mu = 0.1 * jax.random.normal(k2, (out_features,), dtype=jnp.float32)
    bias_log_var = jnp.full((out_features,), -6.0, dtype=jnp.float32)
    return weight_mu, weight_log_var, bias_mu, bias_log_var


if __name__ == "__main__":
    key = jax.random.PRNGKey(0)
    k_param, k_x, k_noise = jax.random.split(key, 3)

    batch, in_features, out_features = 8, 32, 16

    weight_mu, weight_log_var, bias_mu, bias_log_var = init_params(
        k_param, in_features, out_features)
    x = jax.random.normal(k_x, (batch, in_features), dtype=jnp.float32)

    # One-time parameter preparation (transpose + pad + exp fused here).
    params = prepare_params(weight_mu, weight_log_var, bias_mu, bias_log_var)
    I_pad, O_pad = params.weight_mu_t.shape
    HI = jax.lax.Precision.HIGHEST

    # ---- Deterministic path (sample=False): check vs plain JAX. ----
    out_det = bayesian_linear_forward(x, params, sample=False)
    out_det = jax.block_until_ready(out_det)
    ref_det = jnp.matmul(x, weight_mu.T, precision=HI) + bias_mu[None, :]
    assert out_det.shape == (batch, out_features)
    assert jnp.allclose(out_det, ref_det, atol=1e-2, rtol=1e-2), "mu-path mismatch"

    # ---- Stochastic path (sample=True): exact reference using the same eps. ----
    out_s = bayesian_linear_forward(x, params, noise_key=k_noise, sample=True)
    out_s = jax.block_until_ready(out_s)
    assert out_s.shape == (batch, out_features)
    assert bool(jnp.all(jnp.isfinite(out_s)))

    w_eps, b_eps = _draw_eps(k_noise, I_pad, O_pad)
    w_sample_t = params.weight_mu_t + params.weight_std_t * w_eps.astype(jnp.float32)
    b_sample = params.bias_mu + params.bias_std * b_eps
    x_pad = _pad2(x, _round_up(batch, 8), I_pad)
    ref_s = (jnp.matmul(x_pad, w_sample_t, precision=HI) + b_sample)[:batch, :out_features]
    assert jnp.allclose(out_s, ref_s, atol=1e-2, rtol=1e-2), "sample-path mismatch"

    # Noise actually applied, and different noise keys give different samples.
    assert float(jnp.max(jnp.abs(out_s - ref_det))) > 1e-5
    out_s2 = bayesian_linear_forward(x, params, noise_key=jax.random.PRNGKey(123),
                                     sample=True)
    out_s2 = jax.block_until_ready(out_s2)
    assert float(jnp.max(jnp.abs(out_s2 - out_s))) > 1e-5

    print("KERNEL_OK")
</pallas_src>

<mosaic_0001>
module attributes {stable_mosaic.version = 11 : i64} {
  func.func @_bayes_linear_mu_kernel(%arg0: i32, %arg1: i32, %arg2: memref<8x128xf32, #tpu.memory_space<vmem>>, %arg3: memref<128x128xf32, #tpu.memory_space<vmem>>, %arg4: memref<1x128xf32, #tpu.memory_space<vmem>>, %arg5: memref<8x128xf32, #tpu.memory_space<vmem>>) attributes {dimension_semantics = [#tpu.dimension_semantics<parallel>, #tpu.dimension_semantics<arbitrary>], iteration_bounds = array<i64: 1, 1>, scalar_prefetch = 0 : i64, scratch_operands = 0 : i64, tpu.core_type = #tpu.core_type<tc>, window_params = [{transform_indices = @transform_0, window_bounds = array<i64: 8, 128>}, {transform_indices = @transform_1, window_bounds = array<i64: 128, 128>}, {transform_indices = @transform_2, window_bounds = array<i64: 1, 128>}, {transform_indices = @transform_3, window_bounds = array<i64: 8, 128>}]} {
    %c0_i32 = arith.constant 0 : i32
    %0 = arith.cmpi eq, %arg1, %c0_i32 : i32
    %1 = arith.extui %0 : i1 to i32
    %c0_i32_0 = arith.constant 0 : i32
    %2 = arith.cmpi ne, %1, %c0_i32_0 : i32
    scf.if %2 {
      %cst_10 = arith.constant 0.000000e+00 : f32
      %12 = vector.broadcast %cst_10 : f32 to vector<8x128xf32>
      %c0_11 = arith.constant 0 : index
      %c0_12 = arith.constant 0 : index
      %13 = vector.load %arg5[%c0_11, %c0_12] : memref<8x128xf32, #tpu.memory_space<vmem>>, vector<8x128xf32>
      tpu.vector_store %arg5[%c0_11, %c0_12], %12 {strides = array<i32>} : memref<8x128xf32, #tpu.memory_space<vmem>>, vector<8x128xf32>,
    } else {
    }
    %c0 = arith.constant 0 : index
    %c0_1 = arith.constant 0 : index
    %3 = vector.load %arg5[%c0, %c0_1] : memref<8x128xf32, #tpu.memory_space<vmem>>, vector<8x128xf32>
    %c0_2 = arith.constant 0 : index
    %c0_3 = arith.constant 0 : index
    %4 = vector.load %arg2[%c0_2, %c0_3] : memref<8x128xf32, #tpu.memory_space<vmem>>, vector<8x128xf32>
    %c0_4 = arith.constant 0 : index
    %c0_5 = arith.constant 0 : index
    %5 = vector.load %arg3[%c0_4, %c0_5] : memref<128x128xf32, #tpu.memory_space<vmem>>, vector<128x128xf32>
    %cst = arith.constant dense<0.000000e+00> : vector<8x128xf32>
    %6 = tpu.matmul %4, %5, %cst {dimension_numbers = #tpu.dot_dimension_numbers<[1], [0], [0], [1], [0, 0, 1, 1], [], []>} : vector<8x128xf32>, vector<128x128xf32>, vector<8x128xf32> -> vector<8x128xf32>
    %7 = arith.addf %3, %6 : vector<8x128xf32>
    %c0_6 = arith.constant 0 : index
    %c0_7 = arith.constant 0 : index
    %8 = vector.load %arg5[%c0_6, %c0_7] : memref<8x128xf32, #tpu.memory_space<vmem>>, vector<8x128xf32>
    tpu.vector_store %arg5[%c0_6, %c0_7], %7 {strides = array<i32>} : memref<8x128xf32, #tpu.memory_space<vmem>>, vector<8x128xf32>,
    %c0_i32_8 = arith.constant 0 : i32
    %9 = arith.cmpi eq, %arg1, %c0_i32_8 : i32
    %10 = arith.extui %9 : i1 to i32
    %c0_i32_9 = arith.constant 0 : i32
    %11 = arith.cmpi ne, %10, %c0_i32_9 : i32
    scf.if %11 {
      %c0_10 = arith.constant 0 : index
      %c0_11 = arith.constant 0 : index
      %12 = vector.load %arg5[%c0_10, %c0_11] : memref<8x128xf32, #tpu.memory_space<vmem>>, vector<8x128xf32>
      %c0_12 = arith.constant 0 : index
      %c0_13 = arith.constant 0 : index
      %13 = vector.load %arg4[%c0_12, %c0_13] : memref<1x128xf32, #tpu.memory_space<vmem>>, vector<1x128xf32>
      %14 = vector.broadcast %13 : vector<1x128xf32> to vector<8x128xf32>
      %15 = arith.addf %12, %14 : vector<8x128xf32>
      %c0_14 = arith.constant 0 : index
      %c0_15 = arith.constant 0 : index
      %16 = vector.load %arg5[%c0_14, %c0_15] : memref<8x128xf32, #tpu.memory_space<vmem>>, vector<8x128xf32>
      tpu.vector_store %arg5[%c0_14, %c0_15], %15 {strides = array<i32>} : memref<8x128xf32, #tpu.memory_space<vmem>>, vector<8x128xf32>,
    } else {
    }
    return
  }
  func.func @transform_0(%arg0: i32, %arg1: i32) -> (i32, i32) {
    %c0_i32 = arith.constant 0 : i32
    %c0_i32_0 = arith.constant 0 : i32
    return %c0_i32, %arg1 : i32, i32
  }
  func.func @transform_1(%arg0: i32, %arg1: i32) -> (i32, i32) {
    %c0_i32 = arith.constant 0 : i32
    return %arg1, %arg0 : i32, i32
  }
  func.func @transform_2(%arg0: i32, %arg1: i32) -> (i32, i32) {
    %c0_i32 = arith.constant 0 : i32
    %c0_i32_0 = arith.constant 0 : i32
    return %c0_i32, %arg0 : i32, i32
  }
  func.func @transform_3(%arg0: i32, %arg1: i32) -> (i32, i32) {
    %c0_i32 = arith.constant 0 : i32
    %c0_i32_0 = arith.constant 0 : i32
    return %c0_i32, %arg0 : i32, i32
  }
}

</mosaic_0001>

<bundles_post_ra>
// kernel: tpu_custom_call.1
= control target key start
LH: loop header
LB: loop body
LE: loop exit
PB: predicated region body
PF: predicated region fallthrough
CT: control target
= control target key end

     0   :  { %8 = vsyncpa [#allocation3], 0  ;;  %s240_s0 = inlined_call_operand.hbm [shape: f32[8,128], index: 0, kind: input, shape index: {}]   ;;  %s241_s1 = inlined_call_operand.hbm [shape: f32[128,128], index: 1, kind: input, shape index: {}]   ;;  %s242_s2 = inlined_call_operand.vmem [shape: f32[1,128], index: 2, kind: input, shape index: {}]   ;;  %s243_s3 = inlined_call_operand.hbm [shape: f32[8,128], index: 3, kind: output, shape index: {}]  }
   0x1   :  { %9 = vsyncpa [#allocation6], 0 }
   0x2   :  { %10 = vsyncpa [#allocation4], 0  ;;  %s16_s14 = sshll.u32 %s240_s0, 4  ;;  %s203_s15 = smov [#allocation2]   ;;  %s17_s14 = int_to_ptr.hbm [resolvable:$true] %s16_s14 }
   0x3   :  { %s18_s16 = sshll.u32 %s203_s15, 4  ;;  %s26_s19 = sshll.u32 %s241_s1, 4  ;;  %s19_s16 = int_to_ptr.vmem [resolvable:$true] %s18_s16  ;;  %s27_s19 = int_to_ptr.hbm [resolvable:$true] %s26_s19 }
   0x4   :  { %21 = dma.hbm_to_vmem [thread:$0]  %s17_s14, 128, %s19_s16, [#allocation3]  }
   0x5   :  { %s204_s20 = smov [#allocation5]   ;;  %s205_s22 = smov 128  }
   0x6   :  { %s28_s21 = sshll.u32 %s204_s20, 4  ;;  %s206_s23 = smov 8   ;;  %s29_s21 = int_to_ptr.vmem [resolvable:$true] %s28_s21 }
   0x7   :  { %34 = dma.hbm_to_vmem [thread:$0]  %s27_s19, 2048, %s29_s21, [#allocation6], %s205_s22, %s205_s22, %s206_s23  }
   0x8   :  { %197 = dma.done.wait [#allocation3], 128  }
   0x9   :  { %198 = vsyncadd [#allocation3], 4294967168 }
   0xa   :  { %199 = dma.done.wait [#allocation6], 2048  }
   0xb   :  { %200 = vsyncadd [#allocation6], 4294965248  ;;  %v67_v0 = vld [vmem:[#allocation5 + $0x78] sm:$0xff]  ;;  %v66_v1 = vld [vmem:[#allocation5 + $0x70] sm:$0xff]  ;;  %s207_s24 = smov [#allocation7]   ;;  %s107_s28 = sshll.u32 %s243_s3, 4  ;;  %s108_s28 = int_to_ptr.hbm [resolvable:$true] %s107_s28 }
   0xc   :  { %68 = vmatpush.msra.mxu0 %v67_v0  ;;  %v65_v2 = vld [vmem:[#allocation5 + $0x68] sm:$0xff]  ;;  %v64_v3 = vld [vmem:[#allocation5 + $0x60] sm:$0xff]  ;;  %v63_v4 = vld [vmem:[#allocation5 + $0x58] sm:$0xff]  ;;  %s105_s25 = sshll.u32 %s207_s24, 4  ;;  %s106_s25 = int_to_ptr.vmem [resolvable:$true] %s105_s25 }
   0xd   :  { %v62_v5 = vld [vmem:[#allocation5 + $0x50] sm:$0xff]  ;;  %v61_v6 = vld [vmem:[#allocation5 + $0x48] sm:$0xff]  ;;  %v60_v7 = vld [vmem:[#allocation5 + $0x40] sm:$0xff] }
   0xe   :  { %69 = vmatpush.msra.mxu0 %v66_v1  ;;  %v59_v8 = vld [vmem:[#allocation5 + $0x38] sm:$0xff]  ;;  %v58_v9 = vld [vmem:[#allocation5 + $0x30] sm:$0xff]  ;;  %v57_v10 = vld [vmem:[#allocation5 + $0x28] sm:$0xff] }
   0xf   :  { %v56_v11 = vld [vmem:[#allocation5 + $0x20] sm:$0xff]  ;;  %v55_v12 = vld [vmem:[#allocation5 + $0x18] sm:$0xff]  ;;  %v54_v13 = vld [vmem:[#allocation5 + $0x10] sm:$0xff] }
  0x10   :  { %70 = vmatpush.msra.mxu0 %v65_v2  ;;  %v53_v14 = vld [vmem:[#allocation5 + $0x8] sm:$0xff]  ;;  %v52_v15 = vld [vmem:[#allocation5] sm:$0xff]  ;;  %v51_v16 = vld [vmem:[#allocation2] sm:$0xff] }
  0x11   :  { %v124_v17 = vld [vmem:[%s242_s2] ss:$0 sm:$0xff] }
  0x12   :  { %71 = vmatpush.msra.mxu0 %v64_v3 }
  0x14   :  { %72 = vmatpush.msra.mxu0 %v63_v4 }
  0x16   :  { %73 = vmatpush.msra.mxu0 %v62_v5 }
  0x18   :  { %74 = vmatpush.msra.mxu0 %v61_v6 }
  0x1a   :  { %75 = vmatpush.msra.mxu0 %v60_v7 }
  0x1c   :  { %76 = vmatpush.msra.mxu0 %v59_v8 }
  0x1e   :  { %77 = vmatpush.msra.mxu0 %v58_v9 }
  0x20   :  { %78 = vmatpush.msra.mxu0 %v57_v10 }
  0x22   :  { %79 = vmatpush.msra.mxu0 %v56_v11 }
  0x24   :  { %80 = vmatpush.msra.mxu0 %v55_v12 }
  0x26   :  { %81 = vmatpush.msra.mxu0 %v54_v13 }
  0x28   :  { %82 = vmatpush.msra.mxu0 %v53_v14 }
  0x2a   :  { %83 = vmatpush.msra.mxu0 %v52_v15 }
  0x2b   :  { %84 = vmatmul.f32.vlgmr.msra.gmra.mxu0 %v51_v16 }
  0xa8   :  { %v85_v18 = vpop.f32.mrf.mxu0 }
  0xa9   :  { %v98_v19 = vadd.f32 %v124_v17, %v85_v18 }
  0xab   :  { %99 = vst [vmem:[#allocation7] sm:$0xff] %v98_v19 }
  0xac   :  { %110 = dma.vmem_to_hbm [thread:$0]  %s106_s25, 128, %s108_s28, [#allocation4]  }
  0xad   :  { %201 = dma.done.wait [#allocation4], 128  }
  0xae   :  { %202 = vsyncadd [#allocation4], 4294967168 }
  0xaf   :  { %115 = vsyncpa [#allocation3], 1 }
  0xb0   :  { %116 = vsyncpa [#allocation6], 1 }
  0xb1   :  { %117 = vsyncpa [#allocation4], 1 }

</bundles_post_ra>
